<compile_context>
chip_gen: v6e
topology: v6e:2x2x1
jax: 0.10.0
libtpu: 0.0.40
codegen_flags: <defaults>
</compile_context>

<pallas_src>
import functools
from typing import NamedTuple

import jax
import jax.numpy as jnp
from jax.experimental import pallas as pl
from jax.experimental.pallas import tpu as pltpu

_LANES = 128
_SUBLANES = 8
_CHUNK_ROWS = 32          # rows per register-resident accumulation chunk
_MAX_BLOCK_R = 1024       # 27 planes * 1024 rows * 512 B = 13.5 MiB/buffer (fits v7x dbl-buffered)


class SlabPlan(NamedTuple):
    n: int            # true number of learner parameters
    n_pad: int        # padded number of parameters (= r_pad * 128)
    r_pad: int        # padded rows of 128 lanes
    br: int           # rows per grid step
    nblk: int         # grid length
    vmem_limit: int   # explicit scoped-VMEM budget for the pallas_call


def make_plan(n, input_size, block_r=512):
    """Pick the slab tiling for N learner parameters."""
    block_r = max(_SUBLANES, min(int(block_r), _MAX_BLOCK_R))
    r = pl.cdiv(n, _LANES)
    nblk = pl.cdiv(r, block_r)
    # Keep both v7x TensorCores busy: >=2 (and even) blocks when there is work.
    if nblk == 1 and r >= 8 * _SUBLANES:
        nblk = 2
    if nblk > 1 and nblk % 2:
        nblk += 1
    br = pl.cdiv(r, nblk)
    br = pl.cdiv(br, _SUBLANES) * _SUBLANES          # sublane-aligned blocks
    r_pad = nblk * br
    planes = input_size + 1 + 3 + 3                  # x + grad + state + out
    bytes_per_block = planes * br * _LANES * 4
    vmem_limit = int(min(56 << 20, max(16 << 20, (5 * 2 * bytes_per_block) // 4)))
    return SlabPlan(n=n, n_pad=r_pad * _LANES, r_pad=r_pad, br=br, nblk=nblk,
                    vmem_limit=vmem_limit)


# ----------------------------- slab layout helpers ----------------------------

def pack_gate_scalars(WF, WI, bF, bI):
    """SMEM scalar layout: [WF_x(0..K-1) | WI_x(0..K-1) | wF_c, wF_f, wI_c, wI_i, bF, bI]."""
    K = WF.shape[0] - 2
    return jnp.concatenate([
        WF[:K, 0], WI[:K, 0],
        jnp.stack([WF[K, 0], WF[K + 1, 0], WI[K, 0], WI[K + 1, 0],
                   bF[0, 0], bI[0, 0]]),
    ]).astype(jnp.float32)


def vec_to_slab(v, plan):
    """[N] or [N,1] -> [r_pad, 128] lane-dense slab (zero padded)."""
    v = jnp.asarray(v, jnp.float32).reshape(-1)
    if plan.n_pad != plan.n:
        v = jnp.pad(v, (0, plan.n_pad - plan.n))
    return v.reshape(plan.r_pad, _LANES)


def slab_to_vec(slab, plan):
    """[r_pad, 128] -> [N, 1]."""
    return slab.reshape(plan.n_pad)[: plan.n].reshape(plan.n, 1)


def xT_to_slab(x_T, plan):
    """[K, N] (feature-major) -> [K, r_pad, 128]: pad only, no transpose."""
    x_T = jnp.asarray(x_T, jnp.float32)
    K, n = x_T.shape
    if n != plan.n_pad:
        x_T = jnp.pad(x_T, ((0, 0), (0, plan.n_pad - n)))
    return x_T.reshape(K, plan.r_pad, _LANES)


def x_to_slab(x_all, plan):
    """[N, K] -> [K, r_pad, 128].

    NOTE: this is a full HBM transpose of x; in a real time loop produce x
    feature-major upstream and use xT_to_slab instead (pad + free reshape)."""
    return xT_to_slab(jnp.asarray(x_all, jnp.float32).T, plan)


# ---------------------------------- kernel ------------------------------------

def _metalstm_kernel(scal_ref, x_ref, grad_ref, state_ref, out_ref, *, input_size):
    # scal_ref : SMEM f32[2K + 6]
    # x_ref    : VMEM f32[K, br, 128]   gate inputs, feature-major (lane-dense in N)
    # grad_ref : VMEM f32[br, 128]      learner-parameter gradients
    # state_ref: VMEM f32[3, br, 128]   planes: c_prev, f_prev, i_prev
    # out_ref  : VMEM f32[3, br, 128]   planes: c_next, f_next, i_next
    K = input_size
    br = grad_ref.shape[0]

    # Hoist every SMEM scalar read out of the vector loops.
    w_fx = [scal_ref[k] for k in range(K)]
    w_ix = [scal_ref[K + k] for k in range(K)]
    wfc, wff = scal_ref[2 * K + 0], scal_ref[2 * K + 1]
    wic, wii = scal_ref[2 * K + 2], scal_ref[2 * K + 3]
    bf, bi = scal_ref[2 * K + 4], scal_ref[2 * K + 5]

    # Chunk over sublanes so the two gate accumulators (plus c_prev / grad) stay
    # in vregs across the entire K accumulation instead of spilling to VMEM.
    for c0 in range(0, br, _CHUNK_ROWS):
        rows = min(_CHUNK_ROWS, br - c0)
        sl = slice(c0, c0 + rows)

        c_prev = state_ref[0, sl, :]
        f_prev = state_ref[1, sl, :]
        i_prev = state_ref[2, sl, :]
        grad = grad_ref[sl, :]

        # Rank-1 contributions of the concatenated c_prev / f_prev / i_prev cols.
        f_lin = bf + wfc * c_prev + wff * f_prev
        i_lin = bi + wic * c_prev + wii * i_prev

        # Gate matvec as K scalar*vector FMAs on the VPU (MXU stays off).
        for k in range(K):
            xk = x_ref[k, sl, :]
            f_lin = f_lin + w_fx[k] * xk
            i_lin = i_lin + w_ix[k] * xk

        # sigmoid(x) = 0.5*tanh(0.5*x) + 0.5 : divide-free, tanh runs on the EUP.
        f_gate = 0.5 * jnp.tanh(0.5 * f_lin) + 0.5
        i_gate = 0.5 * jnp.tanh(0.5 * i_lin) + 0.5

        out_ref[0, sl, :] = f_gate * c_prev - i_gate * grad     # c_next
        out_ref[1, sl, :] = f_lin                               # f_next (pre-activation)
        out_ref[2, sl, :] = i_lin                               # i_next (pre-activation)


# --------------------------------- slab API ------------------------------------

@functools.partial(jax.jit, static_argnames=("plan",))
def metalstm_step_slabs(gate_scalars, x_slab, grad_slab, state_slab, *, plan):
    """One MetaLSTMCell step entirely in slab layout.

    state_slab and the returned slab are [3, r_pad, 128] with planes (c, f, i),
    so the output is directly the next step's state carry (no re-stacking and no
    HBM relayout between timesteps)."""
    K = x_slab.shape[0]
    kernel = functools.partial(_metalstm_kernel, input_size=K)
    return pl.pallas_call(
        kernel,
        out_shape=jax.ShapeDtypeStruct((3, plan.r_pad, _LANES), jnp.float32),
        grid_spec=pltpu.PrefetchScalarGridSpec(
            num_scalar_prefetch=0,
            grid=(plan.nblk,),
            in_specs=[
                pl.BlockSpec(memory_space=pltpu.MemorySpace.SMEM),          # gate scalars
                pl.BlockSpec((K, plan.br, _LANES), lambda i: (0, i, 0)),    # x
                pl.BlockSpec((plan.br, _LANES), lambda i: (i, 0)),          # grad
                pl.BlockSpec((3, plan.br, _LANES), lambda i: (0, i, 0)),    # state (c, f, i)
            ],
            out_specs=pl.BlockSpec((3, plan.br, _LANES), lambda i: (0, i, 0)),
        ),
        compiler_params=pltpu.CompilerParams(
            dimension_semantics=("parallel",),
            vmem_limit_bytes=plan.vmem_limit),
    )(gate_scalars, x_slab, grad_slab, state_slab)


# ----------------------- PyTorch-signature convenience --------------------------

@functools.partial(jax.jit, static_argnames=("block_r",))
def metalstm_cell_forward(x_all, grad, f_prev, i_prev, c_prev,
                          WF, WI, bF, bI, block_r=512):
    """Matches MetaLSTMCell.forward: returns (c_next, (f_next, i_next, c_next)).

    For multi-timestep use prefer the slab API: pack x/grad/state once outside
    the time loop and carry metalstm_step_slabs' output as the next state.  This
    wrapper pays one pad+transpose of x and a few N-sized relayouts per call."""
    n, input_size = x_all.shape
    assert WF.shape == (input_size + 2, 1) and WI.shape == (input_size + 2, 1), \
        "MetaLSTMCell only supports hidden_size == 1"
    plan = make_plan(n, input_size, block_r)

    scalars = pack_gate_scalars(WF, WI, bF, bI)
    x_slab = x_to_slab(x_all, plan)
    grad_slab = vec_to_slab(grad, plan)
    state_slab = jnp.stack([vec_to_slab(c_prev, plan),
                            vec_to_slab(f_prev, plan),
                            vec_to_slab(i_prev, plan)])

    out = metalstm_step_slabs(scalars, x_slab, grad_slab, state_slab, plan=plan)

    c_next = slab_to_vec(out[0], plan)
    f_next = slab_to_vec(out[1], plan)
    i_next = slab_to_vec(out[2], plan)
    return c_next, (f_next, i_next, c_next)


# --------------------------------- reference -----------------------------------

def _reference_forward(x_all, grad, f_prev, i_prev, c_prev, WF, WI, bF, bI):
    hi = jax.lax.Precision.HIGHEST
    f_next = jnp.matmul(jnp.concatenate((x_all, c_prev, f_prev), 1), WF,
                        precision=hi) + bF
    i_next = jnp.matmul(jnp.concatenate((x_all, c_prev, i_prev), 1), WI,
                        precision=hi) + bI
    c_next = jax.nn.sigmoid(f_next) * c_prev - jax.nn.sigmoid(i_next) * grad
    return c_next, f_next, i_next


if __name__ == "__main__":
    input_size = 20          # default cell input size
    hidden_size = 1          # "should be 1 for every parameter in learner"
    n_learner_params = 256   # learner-parameter ("batch") dimension
    T = 3                    # small demo time loop

    key = jax.random.PRNGKey(0)
    ks = jax.random.split(key, 8)

    # Deterministic parameter init mirroring reset_parameters().
    WF = jax.random.uniform(ks[0], (input_size + 2, hidden_size), jnp.float32, -0.01, 0.01)
    WI = jax.random.uniform(ks[1], (input_size + 2, hidden_size), jnp.float32, -0.01, 0.01)
    cI = jax.random.uniform(ks[2], (n_learner_params, 1), jnp.float32, -0.01, 0.01)
    bF = jax.random.uniform(ks[3], (1, hidden_size), jnp.float32, 4.0, 6.0)
    bI = jax.random.uniform(ks[4], (1, hidden_size), jnp.float32, -5.0, -4.0)

    xs = jax.random.normal(ks[5], (T, n_learner_params, input_size), jnp.float32)
    grads = jax.random.normal(ks[6], (T, n_learner_params, 1), jnp.float32)

    # hs is None in the PyTorch forward: f_prev = i_prev = 0, c_prev = cI.
    f0 = jnp.zeros((n_learner_params, hidden_size), jnp.float32)
    i0 = jnp.zeros((n_learner_params, hidden_size), jnp.float32)
    c0 = cI

    # ---- single step via the PyTorch-signature wrapper -------------------------
    c1, (f1, i1, _) = metalstm_cell_forward(xs[0], grads[0], f0, i0, c0, WF, WI, bF, bI)
    jax.block_until_ready((c1, f1, i1))

    c_ref, f_ref, i_ref = _reference_forward(xs[0], grads[0], f0, i0, c0, WF, WI, bF, bI)
    assert jnp.allclose(c1, c_ref, atol=1e-5, rtol=1e-5)
    assert jnp.allclose(f1, f_ref, atol=1e-5, rtol=1e-5)
    assert jnp.allclose(i1, i_ref, atol=1e-5, rtol=1e-5)

    # ---- hot path: slab layout carried across the time loop (pack once) --------
    plan = make_plan(n_learner_params, input_size)
    scalars = pack_gate_scalars(WF, WI, bF, bI)
    # Relayout exactly once outside the loop.  A real meta-learner would emit x
    # feature-major upstream and use xT_to_slab (pad only, no transpose).
    xs_slab = jnp.stack([x_to_slab(xs[t], plan) for t in range(T)])
    gr_slab = jnp.stack([vec_to_slab(grads[t], plan) for t in range(T)])
    state = jnp.stack([vec_to_slab(c0, plan), vec_to_slab(f0, plan), vec_to_slab(i0, plan)])
    for t in range(T):
        state = metalstm_step_slabs(scalars, xs_slab[t], gr_slab[t], state, plan=plan)
    state = jax.block_until_ready(state)

    # Reference time loop.
    f_r, i_r, c_r = f0, i0, c0
    for t in range(T):
        c_r, f_r, i_r = _reference_forward(xs[t], grads[t], f_r, i_r, c_r, WF, WI, bF, bI)
    assert jnp.allclose(slab_to_vec(state[0], plan), c_r, atol=1e-5, rtol=1e-5)
    assert jnp.allclose(slab_to_vec(state[1], plan), f_r, atol=1e-5, rtol=1e-5)
    assert jnp.allclose(slab_to_vec(state[2], plan), i_r, atol=1e-5, rtol=1e-5)

    print("KERNEL_OK")
</pallas_src>

<mosaic_0001>
module attributes {stable_mosaic.version = 11 : i64} {
  func.func @_metalstm_kernel(%arg0: i32, %arg1: memref<46xf32, #tpu.memory_space<smem>>, %arg2: memref<20x8x128xf32, #tpu.memory_space<vmem>>, %arg3: memref<8x128xf32, #tpu.memory_space<vmem>>, %arg4: memref<3x8x128xf32, #tpu.memory_space<vmem>>, %arg5: memref<3x8x128xf32, #tpu.memory_space<vmem>>) attributes {dimension_semantics = [#tpu.dimension_semantics<parallel>], iteration_bounds = array<i64: 1>, scalar_prefetch = 0 : i64, scratch_operands = 0 : i64, tpu.core_type = #tpu.core_type<tc>, window_params = [{transform_indices = @transform_0, window_bounds = array<i64: 46>}, {transform_indices = @transform_1, window_bounds = array<i64: 20, 8, 128>}, {transform_indices = @transform_2, window_bounds = array<i64: 8, 128>}, {transform_indices = @transform_3, window_bounds = array<i64: 3, 8, 128>}, {transform_indices = @transform_4, window_bounds = array<i64: 3, 8, 128>}]} {
    %c0 = arith.constant 0 : index
    %0 = memref.load %arg1[%c0] : memref<46xf32, #tpu.memory_space<smem>>
    %c1 = arith.constant 1 : index
    %1 = memref.load %arg1[%c1] : memref<46xf32, #tpu.memory_space<smem>>
    %c2 = arith.constant 2 : index
    %2 = memref.load %arg1[%c2] : memref<46xf32, #tpu.memory_space<smem>>
    %c3 = arith.constant 3 : index
    %3 = memref.load %arg1[%c3] : memref<46xf32, #tpu.memory_space<smem>>
    %c4 = arith.constant 4 : index
    %4 = memref.load %arg1[%c4] : memref<46xf32, #tpu.memory_space<smem>>
    %c5 = arith.constant 5 : index
    %5 = memref.load %arg1[%c5] : memref<46xf32, #tpu.memory_space<smem>>
    %c6 = arith.constant 6 : index
    %6 = memref.load %arg1[%c6] : memref<46xf32, #tpu.memory_space<smem>>
    %c7 = arith.constant 7 : index
    %7 = memref.load %arg1[%c7] : memref<46xf32, #tpu.memory_space<smem>>
    %c8 = arith.constant 8 : index
    %8 = memref.load %arg1[%c8] : memref<46xf32, #tpu.memory_space<smem>>
    %c9 = arith.constant 9 : index
    %9 = memref.load %arg1[%c9] : memref<46xf32, #tpu.memory_space<smem>>
    %c10 = arith.constant 10 : index
    %10 = memref.load %arg1[%c10] : memref<46xf32, #tpu.memory_space<smem>>
    %c11 = arith.constant 11 : index
    %11 = memref.load %arg1[%c11] : memref<46xf32, #tpu.memory_space<smem>>
    %c12 = arith.constant 12 : index
    %12 = memref.load %arg1[%c12] : memref<46xf32, #tpu.memory_space<smem>>
    %c13 = arith.constant 13 : index
    %13 = memref.load %arg1[%c13] : memref<46xf32, #tpu.memory_space<smem>>
    %c14 = arith.constant 14 : index
    %14 = memref.load %arg1[%c14] : memref<46xf32, #tpu.memory_space<smem>>
    %c15 = arith.constant 15 : index
    %15 = memref.load %arg1[%c15] : memref<46xf32, #tpu.memory_space<smem>>
    %c16 = arith.constant 16 : index
    %16 = memref.load %arg1[%c16] : memref<46xf32, #tpu.memory_space<smem>>
    %c17 = arith.constant 17 : index
    %17 = memref.load %arg1[%c17] : memref<46xf32, #tpu.memory_space<smem>>
    %c18 = arith.constant 18 : index
    %18 = memref.load %arg1[%c18] : memref<46xf32, #tpu.memory_space<smem>>
    %c19 = arith.constant 19 : index
    %19 = memref.load %arg1[%c19] : memref<46xf32, #tpu.memory_space<smem>>
    %c20 = arith.constant 20 : index
    %20 = memref.load %arg1[%c20] : memref<46xf32, #tpu.memory_space<smem>>
    %c21 = arith.constant 21 : index
    %21 = memref.load %arg1[%c21] : memref<46xf32, #tpu.memory_space<smem>>
    %c22 = arith.constant 22 : index
    %22 = memref.load %arg1[%c22] : memref<46xf32, #tpu.memory_space<smem>>
    %c23 = arith.constant 23 : index
    %23 = memref.load %arg1[%c23] : memref<46xf32, #tpu.memory_space<smem>>
    %c24 = arith.constant 24 : index
    %24 = memref.load %arg1[%c24] : memref<46xf32, #tpu.memory_space<smem>>
    %c25 = arith.constant 25 : index
    %25 = memref.load %arg1[%c25] : memref<46xf32, #tpu.memory_space<smem>>
    %c26 = arith.constant 26 : index
    %26 = memref.load %arg1[%c26] : memref<46xf32, #tpu.memory_space<smem>>
    %c27 = arith.constant 27 : index
    %27 = memref.load %arg1[%c27] : memref<46xf32, #tpu.memory_space<smem>>
    %c28 = arith.constant 28 : index
    %28 = memref.load %arg1[%c28] : memref<46xf32, #tpu.memory_space<smem>>
    %c29 = arith.constant 29 : index
    %29 = memref.load %arg1[%c29] : memref<46xf32, #tpu.memory_space<smem>>
    %c30 = arith.constant 30 : index
    %30 = memref.load %arg1[%c30] : memref<46xf32, #tpu.memory_space<smem>>
    %c31 = arith.constant 31 : index
    %31 = memref.load %arg1[%c31] : memref<46xf32, #tpu.memory_space<smem>>
    %c32 = arith.constant 32 : index
    %32 = memref.load %arg1[%c32] : memref<46xf32, #tpu.memory_space<smem>>
    %c33 = arith.constant 33 : index
    %33 = memref.load %arg1[%c33] : memref<46xf32, #tpu.memory_space<smem>>
    %c34 = arith.constant 34 : index
    %34 = memref.load %arg1[%c34] : memref<46xf32, #tpu.memory_space<smem>>
    %c35 = arith.constant 35 : index
    %35 = memref.load %arg1[%c35] : memref<46xf32, #tpu.memory_space<smem>>
    %c36 = arith.constant 36 : index
    %36 = memref.load %arg1[%c36] : memref<46xf32, #tpu.memory_space<smem>>
    %c37 = arith.constant 37 : index
    %37 = memref.load %arg1[%c37] : memref<46xf32, #tpu.memory_space<smem>>
    %c38 = arith.constant 38 : index
    %38 = memref.load %arg1[%c38] : memref<46xf32, #tpu.memory_space<smem>>
    %c39 = arith.constant 39 : index
    %39 = memref.load %arg1[%c39] : memref<46xf32, #tpu.memory_space<smem>>
    %c40 = arith.constant 40 : index
    %40 = memref.load %arg1[%c40] : memref<46xf32, #tpu.memory_space<smem>>
    %c41 = arith.constant 41 : index
    %41 = memref.load %arg1[%c41] : memref<46xf32, #tpu.memory_space<smem>>
    %c42 = arith.constant 42 : index
    %42 = memref.load %arg1[%c42] : memref<46xf32, #tpu.memory_space<smem>>
    %c43 = arith.constant 43 : index
    %43 = memref.load %arg1[%c43] : memref<46xf32, #tpu.memory_space<smem>>
    %c44 = arith.constant 44 : index
    %44 = memref.load %arg1[%c44] : memref<46xf32, #tpu.memory_space<smem>>
    %c45 = arith.constant 45 : index
    %45 = memref.load %arg1[%c45] : memref<46xf32, #tpu.memory_space<smem>>
    %c0_0 = arith.constant 0 : index
    %c0_1 = arith.constant 0 : index
    %c0_2 = arith.constant 0 : index
    %46 = vector.load %arg4[%c0_0, %c0_1, %c0_2] : memref<3x8x128xf32, #tpu.memory_space<vmem>>, vector<1x8x128xf32>
    %47 = vector.shape_cast %46 : vector<1x8x128xf32> to vector<8x128xf32>
    %c1_3 = arith.constant 1 : index
    %c0_4 = arith.constant 0 : index
    %c0_5 = arith.constant 0 : index
    %48 = vector.load %arg4[%c1_3, %c0_4, %c0_5] : memref<3x8x128xf32, #tpu.memory_space<vmem>>, vector<1x8x128xf32>
    %49 = vector.shape_cast %48 : vector<1x8x128xf32> to vector<8x128xf32>
    %c2_6 = arith.constant 2 : index
    %c0_7 = arith.constant 0 : index
    %c0_8 = arith.constant 0 : index
    %50 = vector.load %arg4[%c2_6, %c0_7, %c0_8] : memref<3x8x128xf32, #tpu.memory_space<vmem>>, vector<1x8x128xf32>
    %51 = vector.shape_cast %50 : vector<1x8x128xf32> to vector<8x128xf32>
    %c0_9 = arith.constant 0 : index
    %c0_10 = arith.constant 0 : index
    %52 = vector.load %arg3[%c0_9, %c0_10] : memref<8x128xf32, #tpu.memory_space<vmem>>, vector<8x128xf32>
    %53 = vector.broadcast %40 : f32 to vector<8x128xf32>
    %54 = arith.mulf %53, %47 : vector<8x128xf32>
    %55 = vector.broadcast %44 : f32 to vector<8x128xf32>
    %56 = arith.addf %55, %54 : vector<8x128xf32>
    %57 = vector.broadcast %41 : f32 to vector<8x128xf32>
    %58 = arith.mulf %57, %49 : vector<8x128xf32>
    %59 = arith.addf %56, %58 : vector<8x128xf32>
    %60 = vector.broadcast %42 : f32 to vector<8x128xf32>
    %61 = arith.mulf %60, %47 : vector<8x128xf32>
    %62 = vector.broadcast %45 : f32 to vector<8x128xf32>
    %63 = arith.addf %62, %61 : vector<8x128xf32>
    %64 = vector.broadcast %43 : f32 to vector<8x128xf32>
    %65 = arith.mulf %64, %51 : vector<8x128xf32>
    %66 = arith.addf %63, %65 : vector<8x128xf32>
    %c0_11 = arith.constant 0 : index
    %c0_12 = arith.constant 0 : index
    %c0_13 = arith.constant 0 : index
    %67 = vector.load %arg2[%c0_11, %c0_12, %c0_13] : memref<20x8x128xf32, #tpu.memory_space<vmem>>, vector<1x8x128xf32>
    %68 = vector.shape_cast %67 : vector<1x8x128xf32> to vector<8x128xf32>
    %69 = vector.broadcast %0 : f32 to vector<8x128xf32>
    %70 = arith.mulf %69, %68 : vector<8x128xf32>
    %71 = arith.addf %59, %70 : vector<8x128xf32>
    %72 = vector.broadcast %20 : f32 to vector<8x128xf32>
    %73 = arith.mulf %72, %68 : vector<8x128xf32>
    %74 = arith.addf %66, %73 : vector<8x128xf32>
    %c1_14 = arith.constant 1 : index
    %c0_15 = arith.constant 0 : index
    %c0_16 = arith.constant 0 : index
    %75 = vector.load %arg2[%c1_14, %c0_15, %c0_16] : memref<20x8x128xf32, #tpu.memory_space<vmem>>, vector<1x8x128xf32>
    %76 = vector.shape_cast %75 : vector<1x8x128xf32> to vector<8x128xf32>
    %77 = vector.broadcast %1 : f32 to vector<8x128xf32>
    %78 = arith.mulf %77, %76 : vector<8x128xf32>
    %79 = arith.addf %71, %78 : vector<8x128xf32>
    %80 = vector.broadcast %21 : f32 to vector<8x128xf32>
    %81 = arith.mulf %80, %76 : vector<8x128xf32>
    %82 = arith.addf %74, %81 : vector<8x128xf32>
    %c2_17 = arith.constant 2 : index
    %c0_18 = arith.constant 0 : index
    %c0_19 = arith.constant 0 : index
    %83 = vector.load %arg2[%c2_17, %c0_18, %c0_19] : memref<20x8x128xf32, #tpu.memory_space<vmem>>, vector<1x8x128xf32>
    %84 = vector.shape_cast %83 : vector<1x8x128xf32> to vector<8x128xf32>
    %85 = vector.broadcast %2 : f32 to vector<8x128xf32>
    %86 = arith.mulf %85, %84 : vector<8x128xf32>
    %87 = arith.addf %79, %86 : vector<8x128xf32>
    %88 = vector.broadcast %22 : f32 to vector<8x128xf32>
    %89 = arith.mulf %88, %84 : vector<8x128xf32>
    %90 = arith.addf %82, %89 : vector<8x128xf32>
    %c3_20 = arith.constant 3 : index
    %c0_21 = arith.constant 0 : index
    %c0_22 = arith.constant 0 : index
    %91 = vector.load %arg2[%c3_20, %c0_21, %c0_22] : memref<20x8x128xf32, #tpu.memory_space<vmem>>, vector<1x8x128xf32>
    %92 = vector.shape_cast %91 : vector<1x8x128xf32> to vector<8x128xf32>
    %93 = vector.broadcast %3 : f32 to vector<8x128xf32>
    %94 = arith.mulf %93, %92 : vector<8x128xf32>
    %95 = arith.addf %87, %94 : vector<8x128xf32>
    %96 = vector.broadcast %23 : f32 to vector<8x128xf32>
    %97 = arith.mulf %96, %92 : vector<8x128xf32>
    %98 = arith.addf %90, %97 : vector<8x128xf32>
    %c4_23 = arith.constant 4 : index
    %c0_24 = arith.constant 0 : index
    %c0_25 = arith.constant 0 : index
    %99 = vector.load %arg2[%c4_23, %c0_24, %c0_25] : memref<20x8x128xf32, #tpu.memory_space<vmem>>, vector<1x8x128xf32>
    %100 = vector.shape_cast %99 : vector<1x8x128xf32> to vector<8x128xf32>
    %101 = vector.broadcast %4 : f32 to vector<8x128xf32>
    %102 = arith.mulf %101, %100 : vector<8x128xf32>
    %103 = arith.addf %95, %102 : vector<8x128xf32>
    %104 = vector.broadcast %24 : f32 to vector<8x128xf32>
    %105 = arith.mulf %104, %100 : vector<8x128xf32>
    %106 = arith.addf %98, %105 : vector<8x128xf32>
    %c5_26 = arith.constant 5 : index
    %c0_27 = arith.constant 0 : index
    %c0_28 = arith.constant 0 : index
    %107 = vector.load %arg2[%c5_26, %c0_27, %c0_28] : memref<20x8x128xf32, #tpu.memory_space<vmem>>, vector<1x8x128xf32>
    %108 = vector.shape_cast %107 : vector<1x8x128xf32> to vector<8x128xf32>
    %109 = vector.broadcast %5 : f32 to vector<8x128xf32>
    %110 = arith.mulf %109, %108 : vector<8x128xf32>
    %111 = arith.addf %103, %110 : vector<8x128xf32>
    %112 = vector.broadcast %25 : f32 to vector<8x128xf32>
    %113 = arith.mulf %112, %108 : vector<8x128xf32>
    %114 = arith.addf %106, %113 : vector<8x128xf32>
    %c6_29 = arith.constant 6 : index
    %c0_30 = arith.constant 0 : index
    %c0_31 = arith.constant 0 : index
    %115 = vector.load %arg2[%c6_29, %c0_30, %c0_31] : memref<20x8x128xf32, #tpu.memory_space<vmem>>, vector<1x8x128xf32>
    %116 = vector.shape_cast %115 : vector<1x8x128xf32> to vector<8x128xf32>
    %117 = vector.broadcast %6 : f32 to vector<8x128xf32>
    %118 = arith.mulf %117, %116 : vector<8x128xf32>
    %119 = arith.addf %111, %118 : vector<8x128xf32>
    %120 = vector.broadcast %26 : f32 to vector<8x128xf32>
    %121 = arith.mulf %120, %116 : vector<8x128xf32>
    %122 = arith.addf %114, %121 : vector<8x128xf32>
    %c7_32 = arith.constant 7 : index
    %c0_33 = arith.constant 0 : index
    %c0_34 = arith.constant 0 : index
    %123 = vector.load %arg2[%c7_32, %c0_33, %c0_34] : memref<20x8x128xf32, #tpu.memory_space<vmem>>, vector<1x8x128xf32>
    %124 = vector.shape_cast %123 : vector<1x8x128xf32> to vector<8x128xf32>
    %125 = vector.broadcast %7 : f32 to vector<8x128xf32>
    %126 = arith.mulf %125, %124 : vector<8x128xf32>
    %127 = arith.addf %119, %126 : vector<8x128xf32>
    %128 = vector.broadcast %27 : f32 to vector<8x128xf32>
    %129 = arith.mulf %128, %124 : vector<8x128xf32>
    %130 = arith.addf %122, %129 : vector<8x128xf32>
    %c8_35 = arith.constant 8 : index
    %c0_36 = arith.constant 0 : index
    %c0_37 = arith.constant 0 : index
    %131 = vector.load %arg2[%c8_35, %c0_36, %c0_37] : memref<20x8x128xf32, #tpu.memory_space<vmem>>, vector<1x8x128xf32>
    %132 = vector.shape_cast %131 : vector<1x8x128xf32> to vector<8x128xf32>
    %133 = vector.broadcast %8 : f32 to vector<8x128xf32>
    %134 = arith.mulf %133, %132 : vector<8x128xf32>
    %135 = arith.addf %127, %134 : vector<8x128xf32>
    %136 = vector.broadcast %28 : f32 to vector<8x128xf32>
    %137 = arith.mulf %136, %132 : vector<8x128xf32>
    %138 = arith.addf %130, %137 : vector<8x128xf32>
    %c9_38 = arith.constant 9 : index
    %c0_39 = arith.constant 0 : index
    %c0_40 = arith.constant 0 : index
    %139 = vector.load %arg2[%c9_38, %c0_39, %c0_40] : memref<20x8x128xf32, #tpu.memory_space<vmem>>, vector<1x8x128xf32>
    %140 = vector.shape_cast %139 : vector<1x8x128xf32> to vector<8x128xf32>
    %141 = vector.broadcast %9 : f32 to vector<8x128xf32>
    %142 = arith.mulf %141, %140 : vector<8x128xf32>
    %143 = arith.addf %135, %142 : vector<8x128xf32>
    %144 = vector.broadcast %29 : f32 to vector<8x128xf32>
    %145 = arith.mulf %144, %140 : vector<8x128xf32>
    %146 = arith.addf %138, %145 : vector<8x128xf32>
    %c10_41 = arith.constant 10 : index
    %c0_42 = arith.constant 0 : index
    %c0_43 = arith.constant 0 : index
    %147 = vector.load %arg2[%c10_41, %c0_42, %c0_43] : memref<20x8x128xf32, #tpu.memory_space<vmem>>, vector<1x8x128xf32>
    %148 = vector.shape_cast %147 : vector<1x8x128xf32> to vector<8x128xf32>
    %149 = vector.broadcast %10 : f32 to vector<8x128xf32>
    %150 = arith.mulf %149, %148 : vector<8x128xf32>
    %151 = arith.addf %143, %150 : vector<8x128xf32>
    %152 = vector.broadcast %30 : f32 to vector<8x128xf32>
    %153 = arith.mulf %152, %148 : vector<8x128xf32>
    %154 = arith.addf %146, %153 : vector<8x128xf32>
    %c11_44 = arith.constant 11 : index
    %c0_45 = arith.constant 0 : index
    %c0_46 = arith.constant 0 : index
    %155 = vector.load %arg2[%c11_44, %c0_45, %c0_46] : memref<20x8x128xf32, #tpu.memory_space<vmem>>, vector<1x8x128xf32>
    %156 = vector.shape_cast %155 : vector<1x8x128xf32> to vector<8x128xf32>
    %157 = vector.broadcast %11 : f32 to vector<8x128xf32>
    %158 = arith.mulf %157, %156 : vector<8x128xf32>
    %159 = arith.addf %151, %158 : vector<8x128xf32>
    %160 = vector.broadcast %31 : f32 to vector<8x128xf32>
    %161 = arith.mulf %160, %156 : vector<8x128xf32>
    %162 = arith.addf %154, %161 : vector<8x128xf32>
    %c12_47 = arith.constant 12 : index
    %c0_48 = arith.constant 0 : index
    %c0_49 = arith.constant 0 : index
    %163 = vector.load %arg2[%c12_47, %c0_48, %c0_49] : memref<20x8x128xf32, #tpu.memory_space<vmem>>, vector<1x8x128xf32>
    %164 = vector.shape_cast %163 : vector<1x8x128xf32> to vector<8x128xf32>
    %165 = vector.broadcast %12 : f32 to vector<8x128xf32>
    %166 = arith.mulf %165, %164 : vector<8x128xf32>
    %167 = arith.addf %159, %166 : vector<8x128xf32>
    %168 = vector.broadcast %32 : f32 to vector<8x128xf32>
    %169 = arith.mulf %168, %164 : vector<8x128xf32>
    %170 = arith.addf %162, %169 : vector<8x128xf32>
    %c13_50 = arith.constant 13 : index
    %c0_51 = arith.constant 0 : index
    %c0_52 = arith.constant 0 : index
    %171 = vector.load %arg2[%c13_50, %c0_51, %c0_52] : memref<20x8x128xf32, #tpu.memory_space<vmem>>, vector<1x8x128xf32>
    %172 = vector.shape_cast %171 : vector<1x8x128xf32> to vector<8x128xf32>
    %173 = vector.broadcast %13 : f32 to vector<8x128xf32>
    %174 = arith.mulf %173, %172 : vector<8x128xf32>
    %175 = arith.addf %167, %174 : vector<8x128xf32>
    %176 = vector.broadcast %33 : f32 to vector<8x128xf32>
    %177 = arith.mulf %176, %172 : vector<8x128xf32>
    %178 = arith.addf %170, %177 : vector<8x128xf32>
    %c14_53 = arith.constant 14 : index
    %c0_54 = arith.constant 0 : index
    %c0_55 = arith.constant 0 : index
    %179 = vector.load %arg2[%c14_53, %c0_54, %c0_55] : memref<20x8x128xf32, #tpu.memory_space<vmem>>, vector<1x8x128xf32>
    %180 = vector.shape_cast %179 : vector<1x8x128xf32> to vector<8x128xf32>
    %181 = vector.broadcast %14 : f32 to vector<8x128xf32>
    %182 = arith.mulf %181, %180 : vector<8x128xf32>
    %183 = arith.addf %175, %182 : vector<8x128xf32>
    %184 = vector.broadcast %34 : f32 to vector<8x128xf32>
    %185 = arith.mulf %184, %180 : vector<8x128xf32>
    %186 = arith.addf %178, %185 : vector<8x128xf32>
    %c15_56 = arith.constant 15 : index
    %c0_57 = arith.constant 0 : index
    %c0_58 = arith.constant 0 : index
    %187 = vector.load %arg2[%c15_56, %c0_57, %c0_58] : memref<20x8x128xf32, #tpu.memory_space<vmem>>, vector<1x8x128xf32>
    %188 = vector.shape_cast %187 : vector<1x8x128xf32> to vector<8x128xf32>
    %189 = vector.broadcast %15 : f32 to vector<8x128xf32>
    %190 = arith.mulf %189, %188 : vector<8x128xf32>
    %191 = arith.addf %183, %190 : vector<8x128xf32>
    %192 = vector.broadcast %35 : f32 to vector<8x128xf32>
    %193 = arith.mulf %192, %188 : vector<8x128xf32>
    %194 = arith.addf %186, %193 : vector<8x128xf32>
    %c16_59 = arith.constant 16 : index
    %c0_60 = arith.constant 0 : index
    %c0_61 = arith.constant 0 : index
    %195 = vector.load %arg2[%c16_59, %c0_60, %c0_61] : memref<20x8x128xf32, #tpu.memory_space<vmem>>, vector<1x8x128xf32>
    %196 = vector.shape_cast %195 : vector<1x8x128xf32> to vector<8x128xf32>
    %197 = vector.broadcast %16 : f32 to vector<8x128xf32>
    %198 = arith.mulf %197, %196 : vector<8x128xf32>
    %199 = arith.addf %191, %198 : vector<8x128xf32>
    %200 = vector.broadcast %36 : f32 to vector<8x128xf32>
    %201 = arith.mulf %200, %196 : vector<8x128xf32>
    %202 = arith.addf %194, %201 : vector<8x128xf32>
    %c17_62 = arith.constant 17 : index
    %c0_63 = arith.constant 0 : index
    %c0_64 = arith.constant 0 : index
    %203 = vector.load %arg2[%c17_62, %c0_63, %c0_64] : memref<20x8x128xf32, #tpu.memory_space<vmem>>, vector<1x8x128xf32>
    %204 = vector.shape_cast %203 : vector<1x8x128xf32> to vector<8x128xf32>
    %205 = vector.broadcast %17 : f32 to vector<8x128xf32>
    %206 = arith.mulf %205, %204 : vector<8x128xf32>
    %207 = arith.addf %199, %206 : vector<8x128xf32>
    %208 = vector.broadcast %37 : f32 to vector<8x128xf32>
    %209 = arith.mulf %208, %204 : vector<8x128xf32>
    %210 = arith.addf %202, %209 : vector<8x128xf32>
    %c18_65 = arith.constant 18 : index
    %c0_66 = arith.constant 0 : index
    %c0_67 = arith.constant 0 : index
    %211 = vector.load %arg2[%c18_65, %c0_66, %c0_67] : memref<20x8x128xf32, #tpu.memory_space<vmem>>, vector<1x8x128xf32>
    %212 = vector.shape_cast %211 : vector<1x8x128xf32> to vector<8x128xf32>
    %213 = vector.broadcast %18 : f32 to vector<8x128xf32>
    %214 = arith.mulf %213, %212 : vector<8x128xf32>
    %215 = arith.addf %207, %214 : vector<8x128xf32>
    %216 = vector.broadcast %38 : f32 to vector<8x128xf32>
    %217 = arith.mulf %216, %212 : vector<8x128xf32>
    %218 = arith.addf %210, %217 : vector<8x128xf32>
    %c19_68 = arith.constant 19 : index
    %c0_69 = arith.constant 0 : index
    %c0_70 = arith.constant 0 : index
    %219 = vector.load %arg2[%c19_68, %c0_69, %c0_70] : memref<20x8x128xf32, #tpu.memory_space<vmem>>, vector<1x8x128xf32>
    %220 = vector.shape_cast %219 : vector<1x8x128xf32> to vector<8x128xf32>
    %221 = vector.broadcast %19 : f32 to vector<8x128xf32>
    %222 = arith.mulf %221, %220 : vector<8x128xf32>
    %223 = arith.addf %215, %222 : vector<8x128xf32>
    %224 = vector.broadcast %39 : f32 to vector<8x128xf32>
    %225 = arith.mulf %224, %220 : vector<8x128xf32>
    %226 = arith.addf %218, %225 : vector<8x128xf32>
    %cst = arith.constant 5.000000e-01 : f32
    %227 = vector.broadcast %cst : f32 to vector<8x128xf32>
    %228 = arith.mulf %227, %223 : vector<8x128xf32>
    %229 = math.tanh %228 : vector<8x128xf32>
    %cst_71 = arith.constant 5.000000e-01 : f32
    %230 = vector.broadcast %cst_71 : f32 to vector<8x128xf32>
    %231 = arith.mulf %230, %229 : vector<8x128xf32>
    %cst_72 = arith.constant 5.000000e-01 : f32
    %232 = vector.broadcast %cst_72 : f32 to vector<8x128xf32>
    %233 = arith.addf %231, %232 : vector<8x128xf32>
    %cst_73 = arith.constant 5.000000e-01 : f32
    %234 = vector.broadcast %cst_73 : f32 to vector<8x128xf32>
    %235 = arith.mulf %234, %226 : vector<8x128xf32>
    %236 = math.tanh %235 : vector<8x128xf32>
    %cst_74 = arith.constant 5.000000e-01 : f32
    %237 = vector.broadcast %cst_74 : f32 to vector<8x128xf32>
    %238 = arith.mulf %237, %236 : vector<8x128xf32>
    %cst_75 = arith.constant 5.000000e-01 : f32
    %239 = vector.broadcast %cst_75 : f32 to vector<8x128xf32>
    %240 = arith.addf %238, %239 : vector<8x128xf32>
    %241 = arith.mulf %233, %47 : vector<8x128xf32>
    %242 = arith.mulf %240, %52 : vector<8x128xf32>
    %243 = arith.subf %241, %242 : vector<8x128xf32>
    %c0_76 = arith.constant 0 : index
    %c0_77 = arith.constant 0 : index
    %c0_78 = arith.constant 0 : index
    %244 = vector.load %arg5[%c0_76, %c0_77, %c0_78] : memref<3x8x128xf32, #tpu.memory_space<vmem>>, vector<1x8x128xf32>
    %245 = vector.shape_cast %244 : vector<1x8x128xf32> to vector<8x128xf32>
    %246 = vector.shape_cast %243 : vector<8x128xf32> to vector<1x8x128xf32>
    tpu.vector_store %arg5[%c0_76, %c0_77, %c0_78], %246 {strides = array<i32>} : memref<3x8x128xf32, #tpu.memory_space<vmem>>, vector<1x8x128xf32>,
    %c1_79 = arith.constant 1 : index
    %c0_80 = arith.constant 0 : index
    %c0_81 = arith.constant 0 : index
    %247 = vector.load %arg5[%c1_79, %c0_80, %c0_81] : memref<3x8x128xf32, #tpu.memory_space<vmem>>, vector<1x8x128xf32>
    %248 = vector.shape_cast %247 : vector<1x8x128xf32> to vector<8x128xf32>
    %249 = vector.shape_cast %223 : vector<8x128xf32> to vector<1x8x128xf32>
    tpu.vector_store %arg5[%c1_79, %c0_80, %c0_81], %249 {strides = array<i32>} : memref<3x8x128xf32, #tpu.memory_space<vmem>>, vector<1x8x128xf32>,
    %c2_82 = arith.constant 2 : index
    %c0_83 = arith.constant 0 : index
    %c0_84 = arith.constant 0 : index
    %250 = vector.load %arg5[%c2_82, %c0_83, %c0_84] : memref<3x8x128xf32, #tpu.memory_space<vmem>>, vector<1x8x128xf32>
    %251 = vector.shape_cast %250 : vector<1x8x128xf32> to vector<8x128xf32>
    %252 = vector.shape_cast %226 : vector<8x128xf32> to vector<1x8x128xf32>
    tpu.vector_store %arg5[%c2_82, %c0_83, %c0_84], %252 {strides = array<i32>} : memref<3x8x128xf32, #tpu.memory_space<vmem>>, vector<1x8x128xf32>,
    return
  }
  func.func @transform_0(%arg0: i32) -> i32 {
    %c0_i32 = arith.constant 0 : i32
    %c0_i32_0 = arith.constant 0 : i32
    return %c0_i32 : i32
  }
  func.func @transform_1(%arg0: i32) -> (i32, i32, i32) {
    %c0_i32 = arith.constant 0 : i32
    %c0_i32_0 = arith.constant 0 : i32
    %c0_i32_1 = arith.constant 0 : i32
    return %c0_i32, %arg0, %c0_i32_0 : i32, i32, i32
  }
  func.func @transform_2(%arg0: i32) -> (i32, i32) {
    %c0_i32 = arith.constant 0 : i32
    %c0_i32_0 = arith.constant 0 : i32
    return %arg0, %c0_i32 : i32, i32
  }
  func.func @transform_3(%arg0: i32) -> (i32, i32, i32) {
    %c0_i32 = arith.constant 0 : i32
    %c0_i32_0 = arith.constant 0 : i32
    %c0_i32_1 = arith.constant 0 : i32
    return %c0_i32, %arg0, %c0_i32_0 : i32, i32, i32
  }
  func.func @transform_4(%arg0: i32) -> (i32, i32, i32) {
    %c0_i32 = arith.constant 0 : i32
    %c0_i32_0 = arith.constant 0 : i32
    %c0_i32_1 = arith.constant 0 : i32
    return %c0_i32, %arg0, %c0_i32_0 : i32, i32, i32
  }
}

</mosaic_0001>

<bundles_post_ra>
// kernel: metalstm_step_slabs.1
= control target key start
LH: loop header
LB: loop body
LE: loop exit
PB: predicated region body
PF: predicated region fallthrough
CT: control target
= control target key end

     0   :  { %9 = vsyncpa [#allocation5], 0  ;;  %s661_s0 = inlined_call_operand.hbm [shape: f32[46], index: 0, kind: input, shape index: {}]   ;;  %s662_s1 = inlined_call_operand.hbm [shape: f32[20,8,128], index: 1, kind: input, shape index: {}]   ;;  %s663_s2 = inlined_call_operand.hbm [shape: f32[8,128], index: 2, kind: input, shape index: {}]   ;;  %s664_s3 = inlined_call_operand.hbm [shape: f32[3,8,128], index: 3, kind: input, shape index: {}]   ;;  %s665_s4 = inlined_call_operand.hbm [shape: f32[3,8,128], index: 4, kind: output, shape index: {}]  }
   0x1   :  { %10 = vsyncpa [#allocation3], 0 }
   0x2   :  { %11 = vsyncpa [#allocation8], 0 }
   0x3   :  { %12 = vsyncpa [#allocation4], 0  ;;  %s480_s15 = smov [#allocation7]   ;;  %s481_s17 = smov [#allocation6]  }
   0x4   :  { %s39_s16 = sshll.u32 %s480_s15, 4  ;;  %s26_s18 = sshll.u32 %s481_s17, 4  ;;  %s40_s16 = int_to_ptr.vmem [resolvable:$true] %s39_s16  ;;  %s27_s18 = int_to_ptr.vmem [resolvable:$true] %s26_s18 }
   0x5   :  { %s392_s19 = scalar_lea.vmem %s40_s16, 128  ;;  %p397_p1 = scmp.lt.s32.totalorder %s40_s16, %s40_s16 }
   0x6   :  { %p393_p0 = scmp.ne.s32.totalorder %s40_s16, %s392_s19  ;;  %p398_p2 = scmp.lt.s32.totalorder %s392_s19, %s392_s19 }
   0x8   :  { %p399_p3 = por %p398_p2, %p397_p1 }
   0xa   :  { %p400_p4 = pnand %p399_p3, %p393_p0 }
   0xc   :  { %403 = shalt.err (!%p400_p4)
}
   0xd   :  { %42 = dma.hbm_to_vmem [thread:$0]  %s663_s2, 128, %s40_s16, [#allocation8]  }
   0xe   :  { %s482_s22 = smov [#allocation2]   ;;  %s420_s25 = scalar_lea.vmem %s27_s18, 2560 }
   0xf   :  { %20 = dma.hbm_to_smem %s661_s0, 16, %s482_s22, [#allocation5]  }
  0x10   :  { %p421_p5 = scmp.ne.s32.totalorder %s27_s18, %s420_s25  ;;  %p425_p6 = scmp.lt.s32.totalorder %s27_s18, %s27_s18 }
  0x11   :  { %p426_p7 = scmp.lt.s32.totalorder %s420_s25, %s420_s25 }
  0x13   :  { %p427_p8 = por %p426_p7, %p425_p6 }
  0x15   :  { %p428_p9 = pnand %p427_p8, %p421_p5 }
  0x17   :  { %431 = shalt.err (!%p428_p9)
}
  0x18   :  { %s483_s26 = smov 128   ;;  %s484_s27 = smov 8  }
  0x19   :  { %32 = dma.hbm_to_vmem [thread:$0]  %s662_s1, 2560, %s27_s18, [#allocation3], %s483_s26, %s483_s26, %s484_s27  }
  0x1a   :  { %s485_s29 = smov [#allocation9]  }
  0x1b   :  { %s48_s30 = sshll.u32 %s485_s29, 4  ;;  %s49_s30 = int_to_ptr.vmem [resolvable:$true] %s48_s30 }
  0x1c   :  { %s440_s0 = scalar_lea.vmem %s49_s30, 384  ;;  %p445_p11 = scmp.lt.s32.totalorder %s49_s30, %s49_s30 }
  0x1d   :  { %p441_p10 = scmp.ne.s32.totalorder %s49_s30, %s440_s0  ;;  %p446_p12 = scmp.lt.s32.totalorder %s440_s0, %s440_s0 }
  0x1f   :  { %p447_p13 = por %p446_p12, %p445_p11 }
  0x21   :  { %p448_p0 = pnand %p447_p13, %p441_p10 }
  0x23   :  { %451 = shalt.err (!%p448_p0)
}
  0x24   :  { %54 = dma.hbm_to_vmem [thread:$0]  %s664_s3, 384, %s49_s30, [#allocation8], %s483_s26, %s483_s26, %s484_s27  }
  0x25   :  { %472 = dma.done.wait [#allocation5], 16  }
  0x26   :  { %473 = vsyncadd [#allocation5], 4294967280 }
  0x27   :  { %474 = dma.done.wait [#allocation3], 2560  }
  0x28   :  { %475 = vsyncadd [#allocation3], 4294964736 }
  0x29   :  { %476 = dma.done.wait [#allocation8], 512  }
  0x2a   :  { %477 = vsyncadd [#allocation8], 4294966784 }
  0x2b   :  { %67 = sfence }
  0x2c   :  { %s530_s1 = sld [smem:[#allocation2]]  ;;  %v542_v0 = vld [vmem:[#allocation9] sm:$0xff]  ;;  %v116_v1 = vld [vmem:[#allocation9 + $0x8] sm:$0xff]  ;;  %v118_v3 = vld [vmem:[#allocation9 + $0x10] sm:$0xff] }
  0x2d   :  { %s532_s7 = sld [smem:[#allocation2 + $0x1]]  ;;  %v134_v7 = vld [vmem:[#allocation6] sm:$0xff]  ;;  %v142_v15 = vld [vmem:[#allocation6 + $0x8] sm:$0xff]  ;;  %v150_v23 = vld [vmem:[#allocation6 + $0x10] sm:$0xff] }
  0x2e   :  { %s534_s8 = sld [smem:[#allocation2 + $0x2]]  ;;  %v158_v30 = vld [vmem:[#allocation6 + $0x18] sm:$0xff]  ;;  %v166_v37 = vld [vmem:[#allocation6 + $0x20] sm:$0xff]  ;;  %v174_v44 = vld [vmem:[#allocation6 + $0x28] sm:$0xff] }
  0x2f   :  { %s536_s9 = sld [smem:[#allocation2 + $0x14]]  ;;  %v182_v51 = vld [vmem:[#allocation6 + $0x30] sm:$0xff]  ;;  %v190_v58 = vld [vmem:[#allocation6 + $0x38] sm:$0xff] }
  0x30   :  { %s538_s10 = sld [smem:[#allocation2 + $0x15]] }
  0x31   :  { %s540_s11 = sld [smem:[#allocation2 + $0x16]] }
  0x32   :  { %s367_s3 = sld [smem:[#allocation2 + $0x28]]  ;;  %v135_v8 = vstv %s530_s1 }
  0x33   :  { %s368_s12 = sld [smem:[#allocation2 + $0x29]]  ;;  %v143_v16 = vstv %s532_s7  ;;  %v136_v19 = vmul.f32 %v135_v8, %v134_v7 }
  0x34   :  { %s369_s13 = sld [smem:[#allocation2 + $0x2a]]  ;;  %v151_v24 = vstv %s534_s8  ;;  %v144_v26 = vmul.f32 %v143_v16, %v142_v15  ;;  %v214_v16 = vld [vmem:[#allocation6 + $0x50] sm:$0xff] }
  0x35   :  { %s370_s14 = sld [smem:[#allocation2 + $0x2b]]  ;;  %v138_v12 = vstv %s536_s9  ;;  %v152_v33 = vmul.f32 %v151_v24, %v150_v23 }
  0x36   :  { %s371_s15 = sld [smem:[#allocation2 + $0x2c]]  ;;  %v146_v20 = vstv %s538_s10  ;;  %v139_v22 = vmul.f32 %v138_v12, %v134_v7 }
  0x37   :  { %s372_s16 = sld [smem:[#allocation2 + $0x2d]]  ;;  %v154_v27 = vstv %s540_s11  ;;  %v147_v29 = vmul.f32 %v146_v20, %v142_v15 }
  0x38   :  { %s544_s17 = sld [smem:[#allocation2 + $0x3]]  ;;  %v120_v2 = vstv %s367_s3  ;;  %v155_v36 = vmul.f32 %v154_v27, %v150_v23  ;;  %v222_v23 = vld [vmem:[#allocation6 + $0x58] sm:$0xff] }
  0x39   :  { %s546_s18 = sld [smem:[#allocation2 + $0x17]]  ;;  %v121_v4 = vmul.f32 %v120_v2, %v542_v0  ;;  %v124_v5 = vstv %s368_s12  ;;  %v198_v2 = vld [vmem:[#allocation6 + $0x40] sm:$0xff] }
  0x3a   :  { %s549_s19 = sld [smem:[#allocation2 + $0x4]]  ;;  %v127_v6 = vstv %s369_s13  ;;  %v125_v9 = vmul.f32 %v124_v5, %v116_v1 }
  0x3b   :  { %s552_s20 = sld [smem:[#allocation2 + $0x18]]  ;;  %v128_v10 = vmul.f32 %v127_v6, %v542_v0  ;;  %v131_v11 = vstv %s370_s14 }
  0x3c   :  { %s556_s21 = sld [smem:[#allocation2 + $0x5]]  ;;  %v122_v13 = vstv %s371_s15  ;;  %v132_v14 = vmul.f32 %v131_v11, %v118_v3 }
  0x3d   :  { %s559_s22 = sld [smem:[#allocation2 + $0x19]]  ;;  %v123_v17 = vadd.f32 %v122_v13, %v121_v4  ;;  %v129_v18 = vstv %s372_s16 }
  0x3e   :  { %s562_s23 = sld [smem:[#allocation2 + $0x6]]  ;;  %v130_v21 = vadd.f32 %v129_v18, %v128_v10  ;;  %v159_v31 = vstv %s544_s17 }
  0x3f   :  { %s565_s24 = sld [smem:[#allocation2 + $0x1a]]  ;;  %v126_v25 = vadd.f32 %v125_v9, %v123_v17  ;;  %v162_v34 = vstv %s546_s18  ;;  %v160_v40 = vmul.f32 %v159_v31, %v158_v30  ;;  %v206_v9 = vld [vmem:[#allocation6 + $0x48] sm:$0xff] }
  0x40   :  { %s568_s25 = sld [smem:[#allocation2 + $0x7]]  ;;  %v133_v28 = vadd.f32 %v132_v14, %v130_v21  ;;  %v167_v38 = vstv %s549_s19  ;;  %v163_v43 = vmul.f32 %v162_v34, %v158_v30  ;;  %v230_v30 = vld [vmem:[#allocation6 + $0x60] sm:$0xff] }
  0x41   :  { %s571_s28 = sld [smem:[#allocation2 + $0x1b]]  ;;  %v137_v32 = vadd.f32 %v136_v19, %v126_v25  ;;  %v170_v41 = vstv %s552_s20  ;;  %v168_v47 = vmul.f32 %v167_v38, %v166_v37 }
  0x42   :  { %s574_s2 = sld [smem:[#allocation2 + $0x8]]  ;;  %v140_v35 = vadd.f32 %v139_v22, %v133_v28  ;;  %v175_v45 = vstv %s556_s21  ;;  %v171_v50 = vmul.f32 %v170_v41, %v166_v37  ;;  %v238_v37 = vld [vmem:[#allocation6 + $0x68] sm:$0xff] }
  0x43   :  { %s577_s29 = sld [smem:[#allocation2 + $0x1c]]  ;;  %v145_v39 = vadd.f32 %v144_v26, %v137_v32  ;;  %v178_v48 = vstv %s559_s22  ;;  %v176_v54 = vmul.f32 %v175_v45, %v174_v44 }
  0x44   :  { %s580_s30 = sld [smem:[#allocation2 + $0x9]]  ;;  %v148_v42 = vadd.f32 %v147_v29, %v140_v35  ;;  %v183_v52 = vstv %s562_s23  ;;  %v179_v57 = vmul.f32 %v178_v48, %v174_v44  ;;  %v246_v44 = vld [vmem:[#allocation6 + $0x70] sm:$0xff]  ;;  %s486_s23 = smov [#allocation10]  }
  0x45   :  { %s583_s0 = sld [smem:[#allocation2 + $0x1d]]  ;;  %v153_v46 = vadd.f32 %v152_v33, %v145_v39  ;;  %v186_v55 = vstv %s565_s24  ;;  %v184_v61 = vmul.f32 %v183_v52, %v182_v51  ;;  %s314_s24 = sshll.u32 %s486_s23, 4  ;;  %s315_s24 = int_to_ptr.vmem [resolvable:$true] %s314_s24 }
  0x46   :  { %s586_s5 = sld [smem:[#allocation2 + $0xa]]  ;;  %v156_v49 = vadd.f32 %v155_v36, %v148_v42  ;;  %v191_v59 = vstv %s568_s25  ;;  %v187_v1 = vmul.f32 %v186_v55, %v182_v51  ;;  %v254_v51 = vld [vmem:[#allocation6 + $0x78] sm:$0xff]  ;;  %s452_s25 = scalar_lea.vmem %s315_s24, 384 }
  0x47   :  { %s589_s6 = sld [smem:[#allocation2 + $0x1e]]  ;;  %v161_v53 = vadd.f32 %v160_v40, %v153_v46  ;;  %v194_v62 = vstv %s571_s28  ;;  %v192_v5 = vmul.f32 %v191_v59, %v190_v58  ;;  %p453_p1 = scmp.ne.s32.totalorder %s315_s24, %s452_s25 }
  0x48   :  { %s592_s1 = sld [smem:[#allocation2 + $0xb]]  ;;  %v164_v56 = vadd.f32 %v163_v43, %v156_v49  ;;  %v199_v3 = vstv %s574_s2  ;;  %v195_v8 = vmul.f32 %v194_v62, %v190_v58  ;;  %v262_v58 = vld [vmem:[#allocation6 + $0x80] sm:$0xff]  ;;  %p457_p2 = scmp.lt.s32.totalorder %s315_s24, %s315_s24 }
  0x49   :  { %s595_s7 = sld [smem:[#allocation2 + $0x1f]]  ;;  %v169_v60 = vadd.f32 %v168_v47, %v161_v53  ;;  %v202_v6 = vstv %s577_s29  ;;  %v200_v12 = vmul.f32 %v199_v3, %v198_v2  ;;  %p458_p3 = scmp.lt.s32.totalorder %s452_s25, %s452_s25 }
  0x4a   :  { %s598_s8 = sld [smem:[#allocation2 + $0xc]]  ;;  %v172_v63 = vadd.f32 %v171_v50, %v164_v56  ;;  %v207_v10 = vstv %s580_s30  ;;  %v203_v15 = vmul.f32 %v202_v6, %v198_v2  ;;  %v270_v2 = vld [vmem:[#allocation6 + $0x88] sm:$0xff] }
  0x4b   :  { %s601_s9 = sld [smem:[#allocation2 + $0x20]]  ;;  %v177_v4 = vadd.f32 %v176_v54, %v169_v60  ;;  %v210_v13 = vstv %s583_s0  ;;  %v208_v19 = vmul.f32 %v207_v10, %v206_v9  ;;  %p459_p4 = por %p458_p3, %p457_p2 }
  0x4c   :  { %s604_s10 = sld [smem:[#allocation2 + $0xd]]  ;;  %v180_v7 = vadd.f32 %v179_v57, %v172_v63  ;;  %v215_v17 = vstv %s586_s5  ;;  %v211_v22 = vmul.f32 %v210_v13, %v206_v9  ;;  %v278_v9 = vld [vmem:[#allocation6 + $0x90] sm:$0xff] }
  0x4d   :  { %s607_s11 = sld [smem:[#allocation2 + $0x21]]  ;;  %v185_v11 = vadd.f32 %v184_v61, %v177_v4  ;;  %v218_v20 = vstv %s589_s6  ;;  %v216_v26 = vmul.f32 %v215_v17, %v214_v16  ;;  %p460_p5 = pnand %p459_p4, %p453_p1 }
  0x4e   :  { %s610_s3 = sld [smem:[#allocation2 + $0xe]]  ;;  %v188_v14 = vadd.f32 %v187_v1, %v180_v7  ;;  %v223_v24 = vstv %s592_s1  ;;  %v219_v29 = vmul.f32 %v218_v20, %v214_v16  ;;  %v286_v16 = vld [vmem:[#allocation6 + $0x98] sm:$0xff] }
  0x4f   :  { %s613_s12 = sld [smem:[#allocation2 + $0x22]]  ;;  %v193_v18 = vadd.f32 %v192_v5, %v185_v11  ;;  %v226_v27 = vstv %s595_s7  ;;  %v224_v33 = vmul.f32 %v223_v24, %v222_v23 }
  0x50   :  { %s616_s13 = sld [smem:[#allocation2 + $0xf]]  ;;  %v196_v21 = vadd.f32 %v195_v8, %v188_v14  ;;  %v231_v31 = vstv %s598_s8  ;;  %v227_v36 = vmul.f32 %v226_v27, %v222_v23 }
  0x51   :  { %s619_s14 = sld [smem:[#allocation2 + $0x23]]  ;;  %v201_v25 = vadd.f32 %v200_v12, %v193_v18  ;;  %v234_v34 = vstv %s601_s9  ;;  %v232_v40 = vmul.f32 %v231_v31, %v230_v30 }
  0x52   :  { %s622_s15 = sld [smem:[#allocation2 + $0x10]]  ;;  %v204_v28 = vadd.f32 %v203_v15, %v196_v21  ;;  %v239_v38 = vstv %s604_s10  ;;  %v235_v43 = vmul.f32 %v234_v34, %v230_v30 }
  0x53   :  { %s625_s16 = sld [smem:[#allocation2 + $0x24]]  ;;  %v209_v32 = vadd.f32 %v208_v19, %v201_v25  ;;  %v242_v41 = vstv %s607_s11  ;;  %v240_v47 = vmul.f32 %v239_v38, %v238_v37 }
  0x54   :  { %s628_s17 = sld [smem:[#allocation2 + $0x11]]  ;;  %v212_v35 = vadd.f32 %v211_v22, %v204_v28  ;;  %v247_v45 = vstv %s610_s3  ;;  %v243_v50 = vmul.f32 %v242_v41, %v238_v37  ;;  %v119_v37 = vld [vmem:[#allocation7] sm:$0xff] }
  0x55   :  { %s631_s18 = sld [smem:[#allocation2 + $0x25]]  ;;  %v217_v39 = vadd.f32 %v216_v26, %v209_v32  ;;  %v250_v48 = vstv %s613_s12  ;;  %v248_v54 = vmul.f32 %v247_v45, %v246_v44 }
  0x56   :  { %s634_s19 = sld [smem:[#allocation2 + $0x12]]  ;;  %v220_v42 = vadd.f32 %v219_v29, %v212_v35  ;;  %v255_v52 = vstv %s616_s13  ;;  %v251_v57 = vmul.f32 %v250_v48, %v246_v44 }
  0x57   :  { %s637_s20 = sld [smem:[#allocation2 + $0x26]]  ;;  %v225_v46 = vadd.f32 %v224_v33, %v217_v39  ;;  %v258_v55 = vstv %s619_s14  ;;  %v256_v61 = vmul.f32 %v255_v52, %v254_v51 }
  0x58   :  { %s640_s21 = sld [smem:[#allocation2 + $0x13]]  ;;  %v228_v49 = vadd.f32 %v227_v36, %v220_v42  ;;  %v263_v59 = vstv %s622_s15  ;;  %v259_v1 = vmul.f32 %v258_v55, %v254_v51 }
  0x59   :  { %s643_s22 = sld [smem:[#allocation2 + $0x27]]  ;;  %v233_v53 = vadd.f32 %v232_v40, %v225_v46  ;;  %v266_v62 = vstv %s625_s16  ;;  %v264_v5 = vmul.f32 %v263_v59, %v262_v58 }
  0x5a   :  { %v236_v56 = vadd.f32 %v235_v43, %v228_v49  ;;  %v271_v3 = vstv %s628_s17  ;;  %v267_v8 = vmul.f32 %v266_v62, %v262_v58 }
  0x5b   :  { %v241_v60 = vadd.f32 %v240_v47, %v233_v53  ;;  %v274_v6 = vstv %s631_s18  ;;  %v272_v12 = vmul.f32 %v271_v3, %v270_v2 }
  0x5c   :  { %v244_v63 = vadd.f32 %v243_v50, %v236_v56  ;;  %v279_v10 = vstv %s634_s19  ;;  %v275_v15 = vmul.f32 %v274_v6, %v270_v2 }
  0x5d   :  { %v249_v4 = vadd.f32 %v248_v54, %v241_v60  ;;  %v282_v13 = vstv %s637_s20  ;;  %v280_v19 = vmul.f32 %v279_v10, %v278_v9 }
  0x5e   :  { %v252_v7 = vadd.f32 %v251_v57, %v244_v63  ;;  %v287_v17 = vstv %s640_s21  ;;  %v283_v22 = vmul.f32 %v282_v13, %v278_v9 }
  0x5f   :  { %v257_v11 = vadd.f32 %v256_v61, %v249_v4  ;;  %v290_v20 = vstv %s643_s22  ;;  %v288_v24 = vmul.f32 %v287_v17, %v286_v16 }
  0x60   :  { %v260_v14 = vadd.f32 %v259_v1, %v252_v7  ;;  %v291_v26 = vmul.f32 %v290_v20, %v286_v16 }
  0x61   :  { %v265_v18 = vadd.f32 %v264_v5, %v257_v11 }
  0x62   :  { %v268_v21 = vadd.f32 %v267_v8, %v260_v14 }
  0x63   :  { %v273_v23 = vadd.f32 %v272_v12, %v265_v18 }
  0x64   :  { %v276_v25 = vadd.f32 %v275_v15, %v268_v21 }
  0x65   :  { %v281_v27 = vadd.f32 %v280_v19, %v273_v23 }
  0x66   :  { %v284_v28 = vadd.f32 %v283_v22, %v276_v25 }
  0x67   :  { %v289_v29 = vadd.f32 %v288_v24, %v281_v27 }
  0x68   :  { %v292_v30 = vadd.f32 %v291_v26, %v284_v28 }
  0x69   :  { %v293_v31 = vmul.f32 0.5, %v289_v29  ;;  %306 = vst [vmem:[#allocation10 + $0x8] sm:$0xff] %v289_v29 }
  0x6a   :  { %v297_v32 = vmul.f32 0.5, %v292_v30  ;;  %308 = vst [vmem:[#allocation10 + $0x10] sm:$0xff] %v292_v30 }
  0x6b   :  { %380 = vtanh.f32 %v293_v31 }
  0x6c   :  { %382 = vtanh.f32 %v297_v32 }
  0x78   :  { %v381_v33 = vpop.eup %380 }
  0x79   :  { %v383_v34 = vpop.eup %382  ;;  %v295_v35 = vmul.f32 0.5, %v381_v33 }
  0x7a   :  { %v299_v36 = vmul.f32 0.5, %v383_v34 }
  0x7b   :  { %v296_v38 = vadd.f32 0.5, %v295_v35 }
  0x7c   :  { %v300_v39 = vadd.f32 0.5, %v299_v36 }
  0x7d   :  { %v301_v40 = vmul.f32 %v296_v38, %v542_v0 }
  0x7e   :  { %v302_v41 = vmul.f32 %v300_v39, %v119_v37 }
  0x80   :  { %v303_v42 = vsub.f32 %v301_v40, %v302_v41 }
  0x82   :  { %304 = vst [vmem:[#allocation10] sm:$0xff] %v303_v42 }
  0x83   :  { %463 = shalt.err (!%p460_p5)
}
  0x84   :  { %320 = dma.vmem_to_hbm [thread:$0]  %s315_s24, 384, %s665_s4, [#allocation4], %s483_s26, %s483_s26, %s484_s27  }
  0x85   :  { %478 = dma.done.wait [#allocation4], 384  }
  0x86   :  { %479 = vsyncadd [#allocation4], 4294966912 }
  0x87   :  { %324 = vsyncpa [#allocation3], 1 }
  0x88   :  { %325 = vsyncpa [#allocation8], 1 }
  0x89   :  { %326 = vsyncpa [#allocation4], 1 }
  0x8a   :  { %327 = vsyncpa [#allocation5], 1 }

</bundles_post_ra>
